<compile_context>
chip_gen: v7x
topology: tpu7x:2x2x1
jax: 0.10.0
libtpu: 0.0.40
codegen_flags: <defaults>
</compile_context>

<pallas_src>
import functools

import jax
import jax.numpy as jnp
from jax.experimental import pallas as pl
from jax.experimental.pallas import tpu as pltpu


def _make_divisible(v, divisor=8, min_value=None):
    min_value = min_value or divisor
    new_v = max(min_value, int(v + divisor / 2) // divisor * divisor)
    if new_v < 0.9 * v:
        new_v += divisor
    return new_v


def _round_up(x, m):
    return ((x + m - 1) // m) * m


# ----------------------------------------------------------------------------
# Fused per-batch-element kernel: pool -> fc1 -> relu -> fc2 -> sigmoid -> scale
# ----------------------------------------------------------------------------
def _se_fused_kernel(x_ref, w1t_ref, b1_ref, w2t_ref, b2_ref, o_ref, *, inv_hw):
    # x_ref: (1, C, HWp); weights: w1t (C, R), b1 (1, R), w2t (R, C), b2 (1, C)
    # Squeeze: sum over spatial (lane) axis * 1/HW (padding is zeros, HW is true).
    pooled = jnp.sum(x_ref[...].astype(jnp.float32), axis=-1) * inv_hw      # (1, C)

    # Excitation: fc1 -> ReLU -> fc2 -> sigmoid.
    h = jnp.dot(pooled, w1t_ref[...],
                preferred_element_type=jnp.float32) + b1_ref[...]           # (1, R)
    h = jnp.maximum(h, 0.0)
    s = jnp.dot(h, w2t_ref[...],
                preferred_element_type=jnp.float32) + b2_ref[...]           # (1, C)
    gate = jax.nn.sigmoid(s)                                                # (1, C)

    # Scale: re-read the block from VMEM (don't hold it live across the chain).
    o_ref[...] = x_ref[...] * gate.astype(o_ref.dtype)[:, :, None]


def _se_fused(x_nchw, w1, b1, w2, b2):
    N, C, H, W = x_nchw.shape
    R = w1.shape[0]
    HW = H * W
    HWp = _round_up(HW, 128)   # lane-dense blocks / unmasked stores

    x3 = x_nchw.reshape(N, C, HW)
    if HWp != HW:
        x3 = jnp.pad(x3, ((0, 0), (0, 0), (0, HWp - HW)))

    w1t = jnp.transpose(w1).astype(jnp.float32)   # (C, R)
    w2t = jnp.transpose(w2).astype(jnp.float32)   # (R, C)
    b1r = b1.reshape(1, R).astype(jnp.float32)
    b2r = b2.reshape(1, C).astype(jnp.float32)

    kernel = functools.partial(_se_fused_kernel, inv_hw=1.0 / HW)

    out = pl.pallas_call(
        kernel,
        out_shape=jax.ShapeDtypeStruct((N, C, HWp), x3.dtype),
        grid=(N,),
        in_specs=[
            pl.BlockSpec((1, C, HWp), lambda n: (n, 0, 0)),   # x: one batch elem / step
            pl.BlockSpec((C, R), lambda n: (0, 0)),           # weights stay resident
            pl.BlockSpec((1, R), lambda n: (0, 0)),
            pl.BlockSpec((R, C), lambda n: (0, 0)),
            pl.BlockSpec((1, C), lambda n: (0, 0)),
        ],
        out_specs=pl.BlockSpec((1, C, HWp), lambda n: (n, 0, 0)),
        compiler_params=pltpu.CompilerParams(
            dimension_semantics=("parallel",)),
    )(x3, w1t, b1r, w2t, b2r)

    if HWp != HW:
        out = out[:, :, :HW]
    return out.reshape(N, C, H, W)


# ----------------------------------------------------------------------------
# Two-pass fallback for large C*HW: (1) tiled pooling, (2) tiled scale.
# ----------------------------------------------------------------------------
def _pool_sum_kernel(x_ref, s_ref):
    h = pl.program_id(1)

    @pl.when(h == 0)
    def _():
        s_ref[...] = jnp.zeros_like(s_ref)

    s_ref[...] += jnp.sum(x_ref[...].astype(jnp.float32), axis=-1, keepdims=True)


def _scale_kernel(x_ref, g_ref, o_ref):
    o_ref[...] = x_ref[...] * g_ref[...].astype(o_ref.dtype)


def _se_two_pass(x_nchw, w1, b1, w2, b2, row_tile, hw_tile):
    N, C, H, W = x_nchw.shape
    HW = H * W
    NC = N * C

    hw_tile = min(_round_up(hw_tile, 128), _round_up(HW, 128))
    HWp = _round_up(HW, hw_tile)
    row_tile = min(_round_up(row_tile, 8), _round_up(NC, 8))
    NCp = _round_up(NC, row_tile)

    x2 = x_nchw.reshape(NC, HW)
    x2 = jnp.pad(x2, ((0, NCp - NC), (0, HWp - HW)))   # zero pad -> sums stay exact

    n_r = NCp // row_tile
    n_h = HWp // hw_tile

    # Pass 1: global-sum pooling, accumulated across HW tiles.
    sums = pl.pallas_call(
        _pool_sum_kernel,
        out_shape=jax.ShapeDtypeStruct((NCp, 1), jnp.float32),
        grid=(n_r, n_h),
        in_specs=[pl.BlockSpec((row_tile, hw_tile), lambda r, h: (r, h))],
        out_specs=pl.BlockSpec((row_tile, 1), lambda r, h: (r, 0)),
        compiler_params=pltpu.CompilerParams(
            dimension_semantics=("parallel", "arbitrary")),
    )(x2)

    # Excitation on the tiny (N, C) pooled tensor in plain jnp (negligible flops).
    pooled = sums[:NC, 0].reshape(N, C) * (1.0 / HW)
    h = jnp.maximum(pooled @ jnp.transpose(w1) + b1[None, :], 0.0)          # (N, R)
    gate = jax.nn.sigmoid(h @ jnp.transpose(w2) + b2[None, :])              # (N, C)
    gate2 = jnp.pad(gate.reshape(NC, 1).astype(jnp.float32),
                    ((0, NCp - NC), (0, 0)))

    # Pass 2: broadcast-scale x by the gate.
    out = pl.pallas_call(
        _scale_kernel,
        out_shape=jax.ShapeDtypeStruct((NCp, HWp), x_nchw.dtype),
        grid=(n_r, n_h),
        in_specs=[pl.BlockSpec((row_tile, hw_tile), lambda r, h: (r, h)),
                  pl.BlockSpec((row_tile, 1), lambda r, h: (r, 0))],
        out_specs=pl.BlockSpec((row_tile, hw_tile), lambda r, h: (r, h)),
        compiler_params=pltpu.CompilerParams(
            dimension_semantics=("parallel", "parallel")),
    )(x2, gate2)

    return out[:NC, :HW].reshape(N, C, H, W)


# ----------------------------------------------------------------------------
# Public forward
# ----------------------------------------------------------------------------
def se_module_forward(x_nchw, w1, b1, w2, b2, *, force_two_pass=False,
                      row_tile=256, hw_tile=512):
    """x_nchw: (N, C, H, W). w1: (R, C), b1: (R,), w2: (C, R), b2: (C,)."""
    N, C, H, W = x_nchw.shape
    HWp = _round_up(H * W, 128)
    block_bytes = C * HWp * jnp.dtype(x_nchw.dtype).itemsize
    # Fused path: 2 double-buffered input blocks + 2 output blocks must stay
    # well inside the smallest default scoped-VMEM limit (16 MiB on v5e;
    # v7x has only 64 MiB physical), so cap the per-element block at ~3 MiB.
    fused_ok = (not force_two_pass) and (4 * block_bytes <= 12 * 1024 * 1024)
    if fused_ok:
        return _se_fused(x_nchw, w1, b1, w2, b2)
    return _se_two_pass(x_nchw, w1, b1, w2, b2, row_tile, hw_tile)


def reference_forward(x, w1, b1, w2, b2):
    """Pure-JAX reference mirroring the PyTorch module."""
    x_se = jnp.mean(x, axis=(2, 3), keepdims=True)           # (N, C, 1, 1)
    x_se = jnp.einsum('rc,nchw->nrhw', w1, x_se) + b1[None, :, None, None]
    x_se = jnp.maximum(x_se, 0.0)
    x_se = jnp.einsum('cr,nrhw->nchw', w2, x_se) + b2[None, :, None, None]
    return x * jax.nn.sigmoid(x_se)


if __name__ == "__main__":
    key = jax.random.PRNGKey(0)

    # --- Test 1: small SEModule(channels=4) -> fused per-N path -------------
    N, C, H, W = 2, 4, 16, 16
    R = _make_divisible(C // 16, 1, 8)   # = 8
    kx, k1, k2, k3, k4, key = jax.random.split(key, 6)
    x = jax.random.normal(kx, (N, C, H, W), dtype=jnp.float32)
    w1 = jax.random.normal(k1, (R, C), dtype=jnp.float32) * (1.0 / jnp.sqrt(C))
    b1 = jax.random.normal(k2, (R,), dtype=jnp.float32) * 0.1
    w2 = jax.random.normal(k3, (C, R), dtype=jnp.float32) * (1.0 / jnp.sqrt(R))
    b2 = jax.random.normal(k4, (C,), dtype=jnp.float32) * 0.1

    out = jax.block_until_ready(se_module_forward(x, w1, b1, w2, b2))
    ref = reference_forward(x, w1, b1, w2, b2)
    assert out.shape == (N, C, H, W)
    assert jnp.allclose(out, ref, atol=1e-5, rtol=1e-5), "fused path mismatch"

    # --- Test 2: exercise the two-pass fallback (tiled pool + scale) --------
    N2, C2, H2, W2 = 3, 24, 24, 24       # HW=576 (pads to 768), NC=72 (pads to 80)
    R2 = _make_divisible(C2 // 16, 1, 8)  # = 8
    kx, k1, k2, k3, k4, key = jax.random.split(key, 6)
    x_b = jax.random.normal(kx, (N2, C2, H2, W2), dtype=jnp.float32)
    w1_b = jax.random.normal(k1, (R2, C2), dtype=jnp.float32) * (1.0 / jnp.sqrt(C2))
    b1_b = jax.random.normal(k2, (R2,), dtype=jnp.float32) * 0.1
    w2_b = jax.random.normal(k3, (C2, R2), dtype=jnp.float32) * (1.0 / jnp.sqrt(R2))
    b2_b = jax.random.normal(k4, (C2,), dtype=jnp.float32) * 0.1

    out_b = jax.block_until_ready(
        se_module_forward(x_b, w1_b, b1_b, w2_b, b2_b,
                          force_two_pass=True, row_tile=16, hw_tile=256))
    ref_b = reference_forward(x_b, w1_b, b1_b, w2_b, b2_b)
    assert out_b.shape == (N2, C2, H2, W2)
    assert jnp.allclose(out_b, ref_b, atol=1e-5, rtol=1e-5), "two-pass mismatch"

    print("KERNEL_OK")
</pallas_src>

<mosaic_0001>
module attributes {stable_mosaic.version = 11 : i64} {
  func.func @_se_fused_kernel(%arg0: i32, %arg1: memref<1x4x256xf32, #tpu.memory_space<vmem>>, %arg2: memref<4x8xf32, #tpu.memory_space<vmem>>, %arg3: memref<1x8xf32, #tpu.memory_space<vmem>>, %arg4: memref<8x4xf32, #tpu.memory_space<vmem>>, %arg5: memref<1x4xf32, #tpu.memory_space<vmem>>, %arg6: memref<1x4x256xf32, #tpu.memory_space<vmem>>) attributes {dimension_semantics = [#tpu.dimension_semantics<parallel>], iteration_bounds = array<i64: 2>, scalar_prefetch = 0 : i64, scratch_operands = 0 : i64, tpu.core_type = #tpu.core_type<tc>, window_params = [{transform_indices = @transform_0, window_bounds = array<i64: 1, 4, 256>}, {pipeline_mode = #tpu.pipeline_mode<synchronous>, transform_indices = @transform_1, window_bounds = array<i64: 4, 8>}, {pipeline_mode = #tpu.pipeline_mode<synchronous>, transform_indices = @transform_2, window_bounds = array<i64: 1, 8>}, {pipeline_mode = #tpu.pipeline_mode<synchronous>, transform_indices = @transform_3, window_bounds = array<i64: 8, 4>}, {pipeline_mode = #tpu.pipeline_mode<synchronous>, transform_indices = @transform_4, window_bounds = array<i64: 1, 4>}, {transform_indices = @transform_5, window_bounds = array<i64: 1, 4, 256>}]} {
    %c0 = arith.constant 0 : index
    %c0_0 = arith.constant 0 : index
    %c0_1 = arith.constant 0 : index
    %0 = vector.load %arg1[%c0, %c0_0, %c0_1] : memref<1x4x256xf32, #tpu.memory_space<vmem>>, vector<1x4x256xf32>
    %cst = arith.constant dense<0.000000e+00> : vector<1x4xf32>
    %1 = vector.multi_reduction <add>, %0, %cst [2] : vector<1x4x256xf32> to vector<1x4xf32>
    %cst_2 = arith.constant 3.906250e-03 : f32
    %2 = vector.broadcast %cst_2 : f32 to vector<1x4xf32>
    %3 = arith.mulf %1, %2 : vector<1x4xf32>
    %c0_3 = arith.constant 0 : index
    %c0_4 = arith.constant 0 : index
    %4 = vector.load %arg2[%c0_3, %c0_4] : memref<4x8xf32, #tpu.memory_space<vmem>>, vector<4x8xf32>
    %cst_5 = arith.constant dense<0.000000e+00> : vector<1x8xf32>
    %5 = tpu.matmul %3, %4, %cst_5 {dimension_numbers = #tpu.dot_dimension_numbers<[1], [0], [0], [1], [0, 0, 1, 1], [], []>} : vector<1x4xf32>, vector<4x8xf32>, vector<1x8xf32> -> vector<1x8xf32>
    %c0_6 = arith.constant 0 : index
    %c0_7 = arith.constant 0 : index
    %6 = vector.load %arg3[%c0_6, %c0_7] : memref<1x8xf32, #tpu.memory_space<vmem>>, vector<1x8xf32>
    %7 = arith.addf %5, %6 : vector<1x8xf32>
    %cst_8 = arith.constant 0.000000e+00 : f32
    %8 = vector.broadcast %cst_8 : f32 to vector<1x8xf32>
    %9 = arith.maximumf %7, %8 : vector<1x8xf32>
    %c0_9 = arith.constant 0 : index
    %c0_10 = arith.constant 0 : index
    %10 = vector.load %arg4[%c0_9, %c0_10] : memref<8x4xf32, #tpu.memory_space<vmem>>, vector<8x4xf32>
    %cst_11 = arith.constant dense<0.000000e+00> : vector<1x4xf32>
    %11 = tpu.matmul %9, %10, %cst_11 {dimension_numbers = #tpu.dot_dimension_numbers<[1], [0], [0], [1], [0, 0, 1, 1], [], []>} : vector<1x8xf32>, vector<8x4xf32>, vector<1x4xf32> -> vector<1x4xf32>
    %c0_12 = arith.constant 0 : index
    %c0_13 = arith.constant 0 : index
    %12 = vector.load %arg5[%c0_12, %c0_13] : memref<1x4xf32, #tpu.memory_space<vmem>>, vector<1x4xf32>
    %13 = arith.addf %11, %12 : vector<1x4xf32>
    %14 = arith.negf %13 : vector<1x4xf32>
    %15 = math.exp %14 : vector<1x4xf32>
    %cst_14 = arith.constant 1.000000e+00 : f32
    %16 = vector.broadcast %cst_14 : f32 to vector<1x4xf32>
    %17 = arith.addf %16, %15 : vector<1x4xf32>
    %18 = arith.divf %16, %17 : vector<1x4xf32>
    %c0_15 = arith.constant 0 : index
    %c0_16 = arith.constant 0 : index
    %c0_17 = arith.constant 0 : index
    %19 = vector.load %arg1[%c0_15, %c0_16, %c0_17] : memref<1x4x256xf32, #tpu.memory_space<vmem>>, vector<1x4x256xf32>
    %20 = vector.shape_cast %18 : vector<1x4xf32> to vector<1x4x1xf32>
    %21 = vector.broadcast %20 : vector<1x4x1xf32> to vector<1x4x256xf32>
    %22 = arith.mulf %19, %21 : vector<1x4x256xf32>
    %c0_18 = arith.constant 0 : index
    %c0_19 = arith.constant 0 : index
    %c0_20 = arith.constant 0 : index
    %23 = vector.load %arg6[%c0_18, %c0_19, %c0_20] : memref<1x4x256xf32, #tpu.memory_space<vmem>>, vector<1x4x256xf32>
    tpu.vector_store %arg6[%c0_18, %c0_19, %c0_20], %22 {strides = array<i32>} : memref<1x4x256xf32, #tpu.memory_space<vmem>>, vector<1x4x256xf32>,
    return
  }
  func.func @transform_0(%arg0: i32) -> (i32, i32, i32) {
    %c0_i32 = arith.constant 0 : i32
    %c0_i32_0 = arith.constant 0 : i32
    %c0_i32_1 = arith.constant 0 : i32
    return %arg0, %c0_i32, %c0_i32_0 : i32, i32, i32
  }
  func.func @transform_1(%arg0: i32) -> (i32, i32) {
    %c0_i32 = arith.constant 0 : i32
    %c0_i32_0 = arith.constant 0 : i32
    %c0_i32_1 = arith.constant 0 : i32
    return %c0_i32, %c0_i32_0 : i32, i32
  }
  func.func @transform_2(%arg0: i32) -> (i32, i32) {
    %c0_i32 = arith.constant 0 : i32
    %c0_i32_0 = arith.constant 0 : i32
    %c0_i32_1 = arith.constant 0 : i32
    return %c0_i32, %c0_i32_0 : i32, i32
  }
  func.func @transform_3(%arg0: i32) -> (i32, i32) {
    %c0_i32 = arith.constant 0 : i32
    %c0_i32_0 = arith.constant 0 : i32
    %c0_i32_1 = arith.constant 0 : i32
    return %c0_i32, %c0_i32_0 : i32, i32
  }
  func.func @transform_4(%arg0: i32) -> (i32, i32) {
    %c0_i32 = arith.constant 0 : i32
    %c0_i32_0 = arith.constant 0 : i32
    %c0_i32_1 = arith.constant 0 : i32
    return %c0_i32, %c0_i32_0 : i32, i32
  }
  func.func @transform_5(%arg0: i32) -> (i32, i32, i32) {
    %c0_i32 = arith.constant 0 : i32
    %c0_i32_0 = arith.constant 0 : i32
    %c0_i32_1 = arith.constant 0 : i32
    return %arg0, %c0_i32, %c0_i32_0 : i32, i32, i32
  }
}

</mosaic_0001>

<bundles_post_ra>
// kernel: tpu_custom_call.1
= control target key start
LH: loop header
LB: loop body
LE: loop exit
PB: predicated region body
PF: predicated region fallthrough
CT: control target
= control target key end

     0   :  { %10 = vsyncpa [#allocation3], 0  ;;  %s921_s0 = inlined_call_operand.hbm [shape: f32[2,4,256], index: 0, kind: input, shape index: {}]   ;;  %s922_s1 = inlined_call_operand.vmem [shape: f32[4,8], index: 1, kind: input, shape index: {}]   ;;  %s923_s2 = inlined_call_operand.vmem [shape: f32[1,8], index: 2, kind: input, shape index: {}]   ;;  %s924_s3 = inlined_call_operand.vmem [shape: f32[8,4], index: 3, kind: input, shape index: {}]   ;;  %s925_s4 = inlined_call_operand.vmem [shape: f32[1,4], index: 4, kind: input, shape index: {}]   ;;  %s926_s5 = inlined_call_operand.hbm [shape: f32[2,4,256], index: 5, kind: output, shape index: {}]  }
   0x1   :  { %12 = vsyncpa [#allocation3 + $0x1], 0 }
   0x2   :  { %13 = vsyncpa [#allocation4], 0 }
   0x3   :  { %15 = vsyncpa [#allocation4 + $0x1], 0  ;;  %s744_s18 = smov 0   ;;  %s746_s19 = smov 0  }
   0x4   :  { %s748_s20 = smov 0   ;;  %s750_s21 = smov 0  }
   0x5 LB: > { %s765_s22 = sadd.s32 4294967295, %s707_s21   ;;  %s523_s23 = sadd.s32 4294967294, %s707_s21   ;;  %s707_s21 = sphi %s750_s21, %s941_s21   ;;  %s703_s20 = sphi %s748_s20, %s940_s20   ;;  %s699_s19 = sphi %s746_s19, %s939_s19   ;;  %s695_s18 = sphi %s744_s18, %s938_s18  }
   0x6   : > { %s769_s24 = sadd.s32 1, %s707_s21   ;;  %s28_s25 = sadd.s32 1, %s703_s20 }
   0x7   : > { %s25_s26 = ssub.s32 %s707_s21, %s769_s24  ;;  %p35_p0 = scmp.ne.s32.totalorder %s703_s20, %s699_s19 }
   0x8   : > { %p26_p1 = scmp.eq.s32.totalorder %s25_s26, 0  ;;  %p36_p2 = scmp.eq.s32.totalorder %s707_s21, 0 }
   0x9   : > { %p41_p3 = scmp.ne.s32.totalorder %s699_s19, %s695_s18  ;;  %p42_p4 = scmp.eq.s32.totalorder %s765_s22, 0 }
   0xa   : > { %s781_s27 = scalar_select %p26_p1, %s703_s20, %s28_s25  }
   0xb   : > { %p783_p5 = por %p36_p2, %p35_p0  ;;  %p787_p6 = por %p42_p4, %p41_p3 }
   0xc   : > { %p149_p7 = scmp.eq.s32.totalorder %s765_s22, 1  ;;  %p155_p8 = scmp.eq.s32.totalorder %s523_s23, 1 }
   0xd   : > { %p569_p10 = scmp.lt.s32.totalorder %s707_s21, 2  ;;  %s187_s7 = sand.u32 1, %s703_s20  }
   0xe   : > { %p794_p11 = por %p149_p7, %p35_p0  ;;  %p798_p12 = por %p155_p8, %p41_p3 }
   0xf   : > { %s541_s8 = sshll.u32 %s707_s21, 7  ;;  %s526_s9 = sshll.u32 %s187_s7, 3 }
  0x10   : > { %s930_s30 = scalar_select %p794_p11, 1, 0 }
  0x11   : > { %s931_s6 = scalar_select %p798_p12, 1, 0 }
  0x12   : > { %s807_s12 = scalar_lea.hbm %s921_s0, %s541_s8  ;;  %s191_s13 = scalar_lea.vmem [#allocation2], %s526_s9 }
  0x13   : > { %s199_s14 = sshll.u32 %s191_s13, 4  ;;  %p811_p13 = pnand %p569_p10, %p783_p5  ;;  %s815_s14 = int_to_ptr.vmem [resolvable:$true] %s199_s14 }
  0x14   : > { %s188_s16 = scalar_lea.sflag [#allocation3], %s187_s7  ;;  %s611_s17 = scalar_lea.hbm %s807_s12, 128 }
  0x15   : > { %p612_p2 = scmp.ne.s32.totalorder %s807_s12, %s611_s17  ;;  %p613_p3 = pneg %p811_p13 }
  0x16   : > { %s616_s26 = scalar_lea.hbm %s921_s0, 256  ;;  %p617_p5 = scmp.lt.u32.totalorder %s807_s12, %s921_s0 }
  0x17   : > { %p614_p4 = pnand %p613_p3, %p612_p2  ;;  %p618_p8 = scmp.lt.u32.totalorder %s616_s26, %s611_s17 }
  0x18   : > { %p620_p9 = scmp.lt.u32.totalorder %s611_s17, %s807_s12 }
  0x19   : > { %p615_p7 = pneg %p614_p4  ;;  %p619_p10 = por %p618_p8, %p617_p5 }
  0x1b   : > { %p621_p0 = por %p620_p9, %p619_p10 }
  0x1d   : > { %p622_p1 = pnand %p621_p0, %p615_p7 }
  0x1f   : > { %625 = shalt.err (!%p622_p1)
}
  0x20   : > { %s626_s7 = scalar_lea.vmem %s815_s14, 128  ;;  %s709_s9 = smov [#allocation2]  }
  0x21   : > { %p627_p2 = scmp.ne.s32.totalorder %s815_s14, %s626_s7  ;;  %s631_s10 = sshll.u32 %s709_s9, 4  ;;  %s632_s10 = int_to_ptr.vmem [resolvable:$false] %s631_s10 }
  0x22   : > { %s633_s11 = scalar_lea.vmem %s632_s10, 256  ;;  %p634_p11 = scmp.lt.s32.totalorder %s815_s14, %s632_s10 }
  0x23   : > { %p629_p4 = pnand %p627_p2, %p613_p3  ;;  %p635_p5 = scmp.lt.s32.totalorder %s633_s11, %s626_s7 }
  0x25   : > { %p630_p12 = pneg %p629_p4  ;;  %p636_p8 = por %p635_p5, %p634_p11 }
  0x27   : > { %p637_p9 = pnand %p636_p8, %p630_p12 }
  0x29   : > { %640 = shalt.err (!%p637_p9)
}
  0x2a   : > { %564 = dma.hbm_to_vmem [thread:$0]  (!%p811_p13), %s807_s12, 128, %s815_s14, %s188_s16  }
  0x2b   : > { %p933_p0 = scmp.lt.s32.totalorder %s707_s21, 3  ;;  %p934_p1 = scmp.ge.s32.totalorder %s707_s21, 1 }
  0x2d   : > { %p205_p3 = pnand %p934_p1, %p933_p0 }
  0x2e   : > { %s849_s13 = sand.u32 (!%p205_p3), 1, %s699_s19  }
  0x2f   : > { %208 = sbr.rel (%p205_p3) target bundleno = 798 (0x31e), region = 40  ;;  %s530_s17 = sshll.u32 (!%p205_p3), %s849_s13, 3 }
  0x30   : > { %s211_s23 = scalar_lea.sflag (!%p205_p3), [#allocation3], %s849_s13  ;;  %s214_s15 = scalar_lea.vmem (!%p205_p3), [#allocation2], %s530_s17 }
  0x36   : > { %686 = dma.done.wait (%p787_p6), %s211_s23, 128  }
  0x37   : > { %688 = vsyncadd (%p787_p6), %s211_s23, 4294967168  ;;  %vm245_vm0 = vcmask 1043456   ;;  %v241_v0 = vld [vmem:[%s214_s15] sm:$0xff]  ;;  %v710_v5 = vmov 0.0   ;;  %vm711_vm1 = vmmov 0   ;;  %v255_v7 = vlaneseq  ;;  %s542_s7 = sshll.u32 %s765_s22, 7 }
  0x38   : > { %v243_v1 = vcombine.high %v241_v0, %v241_v0  ;;  %v246_v2 = vsel %vm245_vm0, %v241_v0, 0.0  ;;  %547 = vmatprep.subr.mxu0 %v710_v5  ;;  %v252_v6 = vld [vmem:[%s922_s1] sm:$0xf]  ;;  %552 = vmatprep.subr.mxu1 %v710_v5  ;;  %vm261_vm2 = vcmask 31744   ;;  %vm340_vm3 = vcmask 64512   ;;  %s240_s9 = scalar_lea.vmem [#allocation5], %s530_s17  ;;  %s877_s15 = scalar_lea.hbm %s926_s5, %s542_s7 }
  0x39   : > { %548 = vmatpush3.msk.msra.mxu0 %vm245_vm0, %v252_v6  ;;  %549 = vmatprep.mubr.msk.f32.mxu0 %vm711_vm1, %v710_v5  ;;  %v256_v8 = vand.u32 127, %v255_v7  ;;  %v258_v9 = vshrl.u32 %v255_v7, 7  ;;  %v338_v14 = vld [vmem:[%s924_s3] sm:$0xff]  ;;  %v712_v30 = vmov 839922192   ;;  %s453_s10 = sshll.u32 %s240_s9, 4  ;;  %s879_s10 = int_to_ptr.vmem [resolvable:$true] %s453_s10 }
  0x3a   : > { %v247_v3 = vsel %vm245_vm0, %v243_v1, 0.0  ;;  %554 = vmatprep.mubr.msk.f32.mxu1 %vm711_vm1, %v710_v5  ;;  %553 = vmatpush3.msra.mxu1 %v338_v14  ;;  %v253_v15 = vld [vmem:[%s923_s2] sm:$0x1]  ;;  %v429_v31 = vunpack.c.l.s4 %v712_v30  ;;  %s439_s12 = scalar_lea.sflag [#allocation4], %s849_s13  ;;  %s641_s14 = scalar_lea.vmem %s879_s10, 128 }
  0x3b   : > { %v248_v4 = vadd.f32 %v247_v3, %v246_v2  ;;  %v259_v10 = vsub.s32 %v256_v8, %v258_v9  ;;  %v339_v20 = vld [vmem:[%s925_s4] sm:$0x1]  ;;  %v422_v27 = vsub.s32 0, %v258_v9  ;;  %p642_p6 = scmp.ne.s32.totalorder %s879_s10, %s641_s14  ;;  %p935_p11 = scmp.ne.s32.totalorder %s930_s30, 0 }
  0x3c   : > { %v430_v32 = vunpack.c.0.s8 %v429_v31  ;;  %s713_s22 = smov [#allocation5]  }
  0x3d   : > { %249 = vadd.xlane.f32.xlu0 %v248_v4  ;;  %p643_p12 = pnand %p642_p6, %p935_p11  ;;  %s645_s17 = sshll.u32 %s713_s22, 4  ;;  %s646_s17 = int_to_ptr.vmem [resolvable:$false] %s645_s17 }
  0x3e   : > { %v433_v33 = vsub.s32 %v430_v32, %v258_v9  ;;  %s647_s29 = scalar_lea.vmem %s646_s17, 256  ;;  %p648_p7 = scmp.lt.s32.totalorder %s879_s10, %s646_s17 }
  0x3f   : > { %p644_p13 = pneg %p643_p12  ;;  %p649_p10 = scmp.lt.s32.totalorder %s647_s29, %s641_s14 }
  0x41   : > { %p650_p2 = por %p649_p10, %p648_p7 }
  0x43   : > { %p651_p4 = pnand %p650_p2, %p644_p13 }
  0xca   : > { %v250_v11 = vpop.xlane.xlu0 %249 }
  0xcb   : > { %v251_v12 = vmul.f32 0.00390625, %v250_v11 }
  0xcd   : > { %v260_v13 = vrot.slane %v251_v12, %v259_v10 }
  0xcf   : > { %550 = vmatmul.mubr.msk.f32.vlgmr.msra.gmra.mrb[0].mxu0 %vm261_vm2, %v260_v13 }
 0x1a2   : > { %v333_v16 = vpop.f32.mrb[0].mxu0 }
 0x1a3   : > { %v334_v17 = vadd.f32 %v333_v16, %v253_v15  ;;  %v551_v18 = vpop.f32.mrb[1].mxu0 }
 0x1a5   : > { %v337_v19 = vmax.f32 %v334_v17, 0.0 }
 0x1a7   : > { %555 = vmatmul.mubr.msk.f32.vlgmr.msra.gmra.mrb[0].mxu1 %vm340_vm3, %v337_v19 }
 0x27a   : > { %v410_v21 = vpop.f32.mrb[0].mxu1 }
 0x27b   : > { %v411_v22 = vadd.f32 %v410_v21, %v339_v20  ;;  %v556_v23 = vpop.f32.mrb[1].mxu1 }
 0x27d   : > { %v535_v24 = vmul.f32 -1.442695, %v411_v22 }
 0x27f   : > { %607 = vpow2.f32 %v535_v24 }
 0x289   : > { %v608_v25 = vpop.eup %607 }
 0x28a   : > { %v417_v26 = vadd.f32 1.0, %v608_v25 }
 0x28c   : > { %609 = vrcp.f32 %v417_v26 }
 0x296   : > { %v610_v28 = vpop.eup %609 }
 0x297   : > { %v423_v29 = vrot.slane %v610_v28, %v422_v27 }
 0x299   : > { %425 = vbcast.lane.b32.xlu0 %v423_v29, 256 }
 0x30b   : > { %v426_v34 = vpop.permute.xlu0 %425 }
 0x30c   : > { %v434_v35 = vrot.slane %v426_v34, %v433_v33 }
 0x30e   : > { %v436_v36 = vmul.f32 %v434_v35, %v241_v0 }
 0x310   : > { %437 = vst [vmem:[%s240_s9] sm:$0xff] %v436_v36 }
 0x311   : > { %654 = shalt.err (!%p651_p4)
}
 0x312   : > { %s655_s13 = scalar_lea.hbm %s877_s15, 128  ;;  %s659_s26 = scalar_lea.hbm %s926_s5, 256 }
 0x313   : > { %p656_p5 = scmp.ne.s32.totalorder %s877_s15, %s655_s13  ;;  %p660_p0 = scmp.lt.u32.totalorder %s877_s15, %s926_s5 }
 0x314   : > { %p661_p1 = scmp.lt.u32.totalorder %s659_s26, %s655_s13  ;;  %p663_p6 = scmp.lt.u32.totalorder %s655_s13, %s877_s15 }
 0x315   : > { %p657_p8 = pnand %p656_p5, %p935_p11 }
 0x316   : > { %p662_p3 = por %p661_p1, %p660_p0 }
 0x317   : > { %p658_p9 = pneg %p657_p8 }
 0x318   : > { %p664_p12 = por %p663_p6, %p662_p3 }
 0x31a   : > { %p665_p13 = pnand %p664_p12, %p658_p9 }
 0x31c   : > { %668 = shalt.err (!%p665_p13)
}
 0x31d   : > { %559 = dma.vmem_to_hbm [thread:$0]  (%p935_p11), %s879_s10, 128, %s877_s15, %s439_s12  }
 0x31e PF: > { %s465_s7 = sand.u32 1, %s695_s18   ;;  %p936_p7 = scmp.ne.s32.totalorder %s931_s6, 0 }
 0x31f   : > { %p937_p10 = scmp.ge.s32.totalorder %s707_s21, 2  ;;  %s466_s9 = scalar_lea.sflag [#allocation4], %s465_s7 }
 0x321   : > { %p566_p2 = pnand %p937_p10, %p936_p7 }
 0x323   : > { %690 = dma.done.wait (!%p566_p2), %s466_s9, 128  }
 0x324   : > { %692 = vsyncadd (!%p566_p2), %s466_s9, 4294967168  ;;  %p18_p4 = scmp.ge.s32.totalorder %s769_s24, 4   ;;  %s938_s18 = smov %s699_s19 }
 0x325   : > { %s939_s19 = smov %s703_s20  ;;  %s940_s20 = smov %s781_s27 }
 0x326   : > { %s941_s21 = smov %s769_s24  ;;  %20 = sbr.rel (!%p18_p4) target bundleno = 5 (0x5), region = 85 }
 0x32d   :  { %471 = vsyncpa [#allocation3], 1 }
 0x32e   :  { %473 = vsyncpa [#allocation3 + $0x1], 1 }
 0x32f   :  { %474 = vsyncpa [#allocation4], 1 }
 0x330   :  { %476 = vsyncpa [#allocation4 + $0x1], 1 }

</bundles_post_ra>
